<compile_context>
chip_gen: v7x
topology: tpu7x:2x2x1
jax: 0.10.0
libtpu: 0.0.40
codegen_flags: <defaults>
</compile_context>

<pallas_src>
import jax
import jax.numpy as jnp
from jax.experimental import pallas as pl
from jax.experimental.pallas import tpu as pltpu

LANE = 128
NEG_SLOPE = 0.01  # torch.nn.functional.leaky_relu default negative_slope


def _round_up(n, m):
    return ((n + m - 1) // m) * m


def _leaky_relu(x):
    # leaky_relu(x) == max(x, slope*x) for 0 < slope < 1.
    return jnp.maximum(x, NEG_SLOPE * x)


def mlp_backbone_kernel(x_ref, w1_ref, w2_ref, w3_ref, w4_ref, b_ref, out_ref):
    # x_ref : (Bt, D)  f32  -- cast to bf16 here (no wrapper-side copy)
    # w*_ref: bf16 weights, hidden/output dims zero-padded to Hp lanes
    # b_ref : (4, Hp)  f32 stacked biases
    # out_ref: (1, Bt) f32 lane-packed scalar outputs
    x = x_ref[...].astype(jnp.bfloat16)

    h = jnp.dot(x, w1_ref[...], preferred_element_type=jnp.float32) + b_ref[0:1, :]
    h = _leaky_relu(h)                                                   # (Bt, Hp) f32

    h = jnp.dot(h.astype(jnp.bfloat16), w2_ref[...],
                preferred_element_type=jnp.float32) + b_ref[1:2, :]
    h = _leaky_relu(h)

    h = jnp.dot(h.astype(jnp.bfloat16), w3_ref[...],
                preferred_element_type=jnp.float32) + b_ref[2:3, :]
    h = _leaky_relu(h)

    out = jnp.dot(h.astype(jnp.bfloat16), w4_ref[...],
                  preferred_element_type=jnp.float32) + b_ref[3:4, :]    # (Bt, Hp)

    # Only column 0 of `out` is real (w4 / b4 are zero-padded). Lane-pack it:
    # transpose the tile on the XLU (idle here) and store the single real row
    # as a lane-dense (1, Bt) block instead of the padded (Bt, Hp) f32 tile.
    out_ref[...] = out.T[0:1, :]


def _prepare_params(params):
    """Zero-pad hidden/output widths to 128 lanes, cast weights to bf16,
    stack biases into one (4, Hp) f32 tile (single DMA)."""
    w1, b1, w2, b2, w3, b3, w4, b4 = params
    D, H = w1.shape
    Hp = _round_up(H, LANE)

    def pad2(a, rows, cols):
        return jnp.zeros((rows, cols), a.dtype).at[: a.shape[0], : a.shape[1]].set(a)

    w1p = pad2(w1, D, Hp).astype(jnp.bfloat16)          # (D, Hp)
    w2p = pad2(w2, Hp, Hp).astype(jnp.bfloat16)
    w3p = pad2(w3, Hp, Hp).astype(jnp.bfloat16)
    w4p = pad2(w4, Hp, Hp).astype(jnp.bfloat16)         # real values in [:H, :1]
    biases = jnp.concatenate(
        [pad2(b1, 1, Hp), pad2(b2, 1, Hp), pad2(b3, 1, Hp), pad2(b4, 1, Hp)],
        axis=0).astype(jnp.float32)                      # (4, Hp)
    return w1p, w2p, w3p, w4p, biases, Hp


def mlp_backbone_forward(x, params, *, block_b=512):
    """x: (B, C, H, W) float32 (NCHW). Returns (B, 1) float32.

    block_b is a per-generation tuning knob: 512 is safe everywhere
    (~7 MiB VMEM working set incl. v5e's 16 MiB default scoped VMEM);
    1024 is worth trying on v6e / v7x.
    """
    B = x.shape[0]
    x_flat = x.reshape(B, -1)            # flatten(start_dim=1); layout no-op
    D = x_flat.shape[1]

    w1p, w2p, w3p, w4p, biases, Hp = _prepare_params(params)
    assert w1p.shape[0] == D, "input_dim of params must match flattened x"

    if B <= 128:
        # Tiny batch: one aligned block; the (<= 512 KiB) pad keeps every shape
        # tile-aligned. Copy-elimination only matters at large B.
        Bt = _round_up(B, 8)
        grid0 = 1
        x_in = x_flat if Bt == B else jnp.zeros((Bt, D), x_flat.dtype).at[:B].set(x_flat)
    else:
        # Perf path: stream x_flat f32 directly (no materialized pad/cast copy;
        # bf16 cast happens in-kernel). Bt is a multiple of 128 so the
        # lane-packed (1, Bt) output block is lane-dense, and cdiv(B, 2)
        # guarantees >= 2 grid steps so the "parallel" axis can shard across
        # v7x's two TensorCores. A ragged last block reads a few out-of-bounds
        # rows whose garbage outputs are sliced off below.
        bb = max(LANE, (block_b // LANE) * LANE)
        Bt = min(bb, _round_up(pl.cdiv(B, 2), LANE))
        grid0 = pl.cdiv(B, Bt)
        x_in = x_flat
    Bp = grid0 * Bt                      # output is allocated grid-aligned

    out_row = pl.pallas_call(
        mlp_backbone_kernel,
        out_shape=jax.ShapeDtypeStruct((1, Bp), jnp.float32),
        grid=(grid0,),
        in_specs=[
            pl.BlockSpec((Bt, D), lambda i: (i, 0)),    # x: marches over batch
            pl.BlockSpec((D, Hp), lambda i: (0, 0)),    # w1: VMEM-resident (DMA'd once)
            pl.BlockSpec((Hp, Hp), lambda i: (0, 0)),   # w2
            pl.BlockSpec((Hp, Hp), lambda i: (0, 0)),   # w3
            pl.BlockSpec((Hp, Hp), lambda i: (0, 0)),   # w4 (lane-padded)
            pl.BlockSpec((4, Hp), lambda i: (0, 0)),    # stacked biases
        ],
        out_specs=pl.BlockSpec((1, Bt), lambda i: (0, i)),  # lane-packed scalars
        compiler_params=pltpu.CompilerParams(
            dimension_semantics=("parallel",)),
    )(x_in, w1p, w2p, w3p, w4p, biases)

    return out_row[0, :B].reshape(B, 1)


def init_params(key, input_dim, hidden_size):
    """Deterministic synthetic init. Weights stored as (in, out) so the kernel
    computes x @ W + b (equivalent to PyTorch's x @ W.T + b with W=(out,in))."""
    keys = jax.random.split(key, 8)

    def linear(kw, kb, fan_in, fan_out):
        bound = 1.0 / jnp.sqrt(fan_in)
        w = jax.random.uniform(kw, (fan_in, fan_out), jnp.float32, -bound, bound)
        b = jax.random.uniform(kb, (1, fan_out), jnp.float32, -bound, bound)
        return w, b

    w1, b1 = linear(keys[0], keys[1], input_dim, hidden_size)
    w2, b2 = linear(keys[2], keys[3], hidden_size, hidden_size)
    w3, b3 = linear(keys[4], keys[5], hidden_size, hidden_size)
    w4, b4 = linear(keys[6], keys[7], hidden_size, 1)
    return (w1, b1, w2, b2, w3, b3, w4, b4)


if __name__ == "__main__":
    key = jax.random.PRNGKey(0)
    k_x, k_p = jax.random.split(key)

    # input_shape = (4, 16, 16), hidden_size = 32, batch = 2
    B, C, Hs, Ws = 2, 4, 16, 16
    hidden_size = 32
    input_dim = C * Hs * Ws

    x = jax.random.normal(k_x, (B, C, Hs, Ws), dtype=jnp.float32)
    params = init_params(k_p, input_dim, hidden_size)

    out = mlp_backbone_forward(x, params)
    jax.block_until_ready(out)

    # Reference 1: mimics the kernel's bf16-operand / f32-accumulate math.
    def ref_bf16(x, params):
        w1, b1, w2, b2, w3, b3, w4, b4 = params
        h = x.reshape(x.shape[0], -1).astype(jnp.bfloat16)
        h = _leaky_relu(jnp.dot(h, w1.astype(jnp.bfloat16),
                                preferred_element_type=jnp.float32) + b1)
        h = _leaky_relu(jnp.dot(h.astype(jnp.bfloat16), w2.astype(jnp.bfloat16),
                                preferred_element_type=jnp.float32) + b2)
        h = _leaky_relu(jnp.dot(h.astype(jnp.bfloat16), w3.astype(jnp.bfloat16),
                                preferred_element_type=jnp.float32) + b3)
        return jnp.dot(h.astype(jnp.bfloat16), w4.astype(jnp.bfloat16),
                       preferred_element_type=jnp.float32) + b4

    # Reference 2: pure-f32 math of the original module.
    # NOTE: the kernel uses bf16 MXU operands with f32 accumulation by design;
    # the coarse tolerance below reflects that accepted precision contract.
    def ref_f32(x, params):
        w1, b1, w2, b2, w3, b3, w4, b4 = params
        h = x.reshape(x.shape[0], -1)
        h = _leaky_relu(h @ w1 + b1)
        h = _leaky_relu(h @ w2 + b2)
        h = _leaky_relu(h @ w3 + b3)
        return h @ w4 + b4

    assert out.shape == (B, 1)
    assert jnp.allclose(out, ref_bf16(x, params), atol=5e-3, rtol=5e-3)
    assert jnp.allclose(out, ref_f32(x, params), atol=5e-2, rtol=5e-2)

    print("KERNEL_OK")
</pallas_src>

<mosaic_0001>
module attributes {stable_mosaic.version = 11 : i64} {
  func.func @mlp_backbone_kernel(%arg0: i32, %arg1: memref<8x1024xf32, #tpu.memory_space<vmem>>, %arg2: memref<1024x128xbf16, #tpu.memory_space<vmem>>, %arg3: memref<128x128xbf16, #tpu.memory_space<vmem>>, %arg4: memref<128x128xbf16, #tpu.memory_space<vmem>>, %arg5: memref<128x128xbf16, #tpu.memory_space<vmem>>, %arg6: memref<4x128xf32, #tpu.memory_space<vmem>>, %arg7: memref<1x8xf32, #tpu.memory_space<vmem>>) attributes {dimension_semantics = [#tpu.dimension_semantics<parallel>], iteration_bounds = array<i64: 1>, scalar_prefetch = 0 : i64, scratch_operands = 0 : i64, tpu.core_type = #tpu.core_type<tc>, window_params = [{transform_indices = @transform_0, window_bounds = array<i64: 8, 1024>}, {pipeline_mode = #tpu.pipeline_mode<synchronous>, transform_indices = @transform_1, window_bounds = array<i64: 1024, 128>}, {pipeline_mode = #tpu.pipeline_mode<synchronous>, transform_indices = @transform_2, window_bounds = array<i64: 128, 128>}, {pipeline_mode = #tpu.pipeline_mode<synchronous>, transform_indices = @transform_3, window_bounds = array<i64: 128, 128>}, {pipeline_mode = #tpu.pipeline_mode<synchronous>, transform_indices = @transform_4, window_bounds = array<i64: 128, 128>}, {pipeline_mode = #tpu.pipeline_mode<synchronous>, transform_indices = @transform_5, window_bounds = array<i64: 4, 128>}, {transform_indices = @transform_6, window_bounds = array<i64: 1, 8>}]} {
    %c0 = arith.constant 0 : index
    %c0_0 = arith.constant 0 : index
    %0 = vector.load %arg1[%c0, %c0_0] : memref<8x1024xf32, #tpu.memory_space<vmem>>, vector<8x1024xf32>
    %1 = arith.truncf %0 : vector<8x1024xf32> to vector<8x1024xbf16>
    %c0_1 = arith.constant 0 : index
    %c0_2 = arith.constant 0 : index
    %2 = vector.load %arg2[%c0_1, %c0_2] : memref<1024x128xbf16, #tpu.memory_space<vmem>>, vector<1024x128xbf16>
    %cst = arith.constant dense<0.000000e+00> : vector<8x128xf32>
    %3 = tpu.matmul %1, %2, %cst {dimension_numbers = #tpu.dot_dimension_numbers<[1], [0], [0], [1], [0, 0, 1, 1], [], []>} : vector<8x1024xbf16>, vector<1024x128xbf16>, vector<8x128xf32> -> vector<8x128xf32>
    %c0_3 = arith.constant 0 : index
    %c0_4 = arith.constant 0 : index
    %4 = vector.load %arg6[%c0_3, %c0_4] : memref<4x128xf32, #tpu.memory_space<vmem>>, vector<1x128xf32>
    %5 = vector.broadcast %4 : vector<1x128xf32> to vector<8x128xf32>
    %6 = arith.addf %3, %5 : vector<8x128xf32>
    %cst_5 = arith.constant 0.00999999977 : f32
    %7 = vector.broadcast %cst_5 : f32 to vector<8x128xf32>
    %8 = arith.mulf %7, %6 : vector<8x128xf32>
    %9 = arith.maximumf %6, %8 : vector<8x128xf32>
    %10 = arith.truncf %9 : vector<8x128xf32> to vector<8x128xbf16>
    %c0_6 = arith.constant 0 : index
    %c0_7 = arith.constant 0 : index
    %11 = vector.load %arg3[%c0_6, %c0_7] : memref<128x128xbf16, #tpu.memory_space<vmem>>, vector<128x128xbf16>
    %cst_8 = arith.constant dense<0.000000e+00> : vector<8x128xf32>
    %12 = tpu.matmul %10, %11, %cst_8 {dimension_numbers = #tpu.dot_dimension_numbers<[1], [0], [0], [1], [0, 0, 1, 1], [], []>} : vector<8x128xbf16>, vector<128x128xbf16>, vector<8x128xf32> -> vector<8x128xf32>
    %c1 = arith.constant 1 : index
    %c0_9 = arith.constant 0 : index
    %13 = vector.load %arg6[%c1, %c0_9] : memref<4x128xf32, #tpu.memory_space<vmem>>, vector<1x128xf32>
    %14 = vector.broadcast %13 : vector<1x128xf32> to vector<8x128xf32>
    %15 = arith.addf %12, %14 : vector<8x128xf32>
    %cst_10 = arith.constant 0.00999999977 : f32
    %16 = vector.broadcast %cst_10 : f32 to vector<8x128xf32>
    %17 = arith.mulf %16, %15 : vector<8x128xf32>
    %18 = arith.maximumf %15, %17 : vector<8x128xf32>
    %19 = arith.truncf %18 : vector<8x128xf32> to vector<8x128xbf16>
    %c0_11 = arith.constant 0 : index
    %c0_12 = arith.constant 0 : index
    %20 = vector.load %arg4[%c0_11, %c0_12] : memref<128x128xbf16, #tpu.memory_space<vmem>>, vector<128x128xbf16>
    %cst_13 = arith.constant dense<0.000000e+00> : vector<8x128xf32>
    %21 = tpu.matmul %19, %20, %cst_13 {dimension_numbers = #tpu.dot_dimension_numbers<[1], [0], [0], [1], [0, 0, 1, 1], [], []>} : vector<8x128xbf16>, vector<128x128xbf16>, vector<8x128xf32> -> vector<8x128xf32>
    %c2 = arith.constant 2 : index
    %c0_14 = arith.constant 0 : index
    %22 = vector.load %arg6[%c2, %c0_14] : memref<4x128xf32, #tpu.memory_space<vmem>>, vector<1x128xf32>
    %23 = vector.broadcast %22 : vector<1x128xf32> to vector<8x128xf32>
    %24 = arith.addf %21, %23 : vector<8x128xf32>
    %cst_15 = arith.constant 0.00999999977 : f32
    %25 = vector.broadcast %cst_15 : f32 to vector<8x128xf32>
    %26 = arith.mulf %25, %24 : vector<8x128xf32>
    %27 = arith.maximumf %24, %26 : vector<8x128xf32>
    %28 = arith.truncf %27 : vector<8x128xf32> to vector<8x128xbf16>
    %c0_16 = arith.constant 0 : index
    %c0_17 = arith.constant 0 : index
    %29 = vector.load %arg5[%c0_16, %c0_17] : memref<128x128xbf16, #tpu.memory_space<vmem>>, vector<128x128xbf16>
    %cst_18 = arith.constant dense<0.000000e+00> : vector<8x128xf32>
    %30 = tpu.matmul %28, %29, %cst_18 {dimension_numbers = #tpu.dot_dimension_numbers<[1], [0], [0], [1], [0, 0, 1, 1], [], []>} : vector<8x128xbf16>, vector<128x128xbf16>, vector<8x128xf32> -> vector<8x128xf32>
    %c3 = arith.constant 3 : index
    %c0_19 = arith.constant 0 : index
    %31 = vector.load %arg6[%c3, %c0_19] : memref<4x128xf32, #tpu.memory_space<vmem>>, vector<1x128xf32>
    %32 = vector.broadcast %31 : vector<1x128xf32> to vector<8x128xf32>
    %33 = arith.addf %30, %32 : vector<8x128xf32>
    %34 = tpu.transpose %33, [1, 0] : vector<8x128xf32> -> vector<128x8xf32>
    %35 = vector.extract_strided_slice %34 {offsets = [0, 0], sizes = [1, 8], strides = [1, 1]} : vector<128x8xf32> to vector<1x8xf32>
    %c0_20 = arith.constant 0 : index
    %c0_21 = arith.constant 0 : index
    %36 = vector.load %arg7[%c0_20, %c0_21] : memref<1x8xf32, #tpu.memory_space<vmem>>, vector<1x8xf32>
    tpu.vector_store %arg7[%c0_20, %c0_21], %35 {strides = array<i32>} : memref<1x8xf32, #tpu.memory_space<vmem>>, vector<1x8xf32>,
    return
  }
  func.func @transform_0(%arg0: i32) -> (i32, i32) {
    %c0_i32 = arith.constant 0 : i32
    %c0_i32_0 = arith.constant 0 : i32
    return %arg0, %c0_i32 : i32, i32
  }
  func.func @transform_1(%arg0: i32) -> (i32, i32) {
    %c0_i32 = arith.constant 0 : i32
    %c0_i32_0 = arith.constant 0 : i32
    %c0_i32_1 = arith.constant 0 : i32
    return %c0_i32, %c0_i32_0 : i32, i32
  }
  func.func @transform_2(%arg0: i32) -> (i32, i32) {
    %c0_i32 = arith.constant 0 : i32
    %c0_i32_0 = arith.constant 0 : i32
    %c0_i32_1 = arith.constant 0 : i32
    return %c0_i32, %c0_i32_0 : i32, i32
  }
  func.func @transform_3(%arg0: i32) -> (i32, i32) {
    %c0_i32 = arith.constant 0 : i32
    %c0_i32_0 = arith.constant 0 : i32
    %c0_i32_1 = arith.constant 0 : i32
    return %c0_i32, %c0_i32_0 : i32, i32
  }
  func.func @transform_4(%arg0: i32) -> (i32, i32) {
    %c0_i32 = arith.constant 0 : i32
    %c0_i32_0 = arith.constant 0 : i32
    %c0_i32_1 = arith.constant 0 : i32
    return %c0_i32, %c0_i32_0 : i32, i32
  }
  func.func @transform_5(%arg0: i32) -> (i32, i32) {
    %c0_i32 = arith.constant 0 : i32
    %c0_i32_0 = arith.constant 0 : i32
    %c0_i32_1 = arith.constant 0 : i32
    return %c0_i32, %c0_i32_0 : i32, i32
  }
  func.func @transform_6(%arg0: i32) -> (i32, i32) {
    %c0_i32 = arith.constant 0 : i32
    %c0_i32_0 = arith.constant 0 : i32
    return %c0_i32, %arg0 : i32, i32
  }
}

</mosaic_0001>

<bundles_post_ra>
// kernel: tpu_custom_call.1
= control target key start
LH: loop header
LB: loop body
LE: loop exit
PB: predicated region body
PF: predicated region fallthrough
CT: control target
= control target key end

     0   :  { %11 = vsyncpa [#allocation3], 0  ;;  %s1847_s0 = inlined_call_operand.hbm [shape: f32[8,1024], index: 0, kind: input, shape index: {}]   ;;  %s1848_s1 = inlined_call_operand.hbm [shape: bf16[1024,128], index: 1, kind: input, shape index: {}]   ;;  %s1849_s2 = inlined_call_operand.hbm [shape: bf16[128,128], index: 2, kind: input, shape index: {}]   ;;  %s1850_s3 = inlined_call_operand.hbm [shape: bf16[128,128], index: 3, kind: input, shape index: {}]   ;;  %s1851_s4 = inlined_call_operand.hbm [shape: bf16[128,128], index: 4, kind: input, shape index: {}]   ;;  %s1852_s5 = inlined_call_operand.vmem [shape: f32[4,128], index: 5, kind: input, shape index: {}]   ;;  %s1853_s6 = inlined_call_operand.hbm [shape: f32[1,8], index: 6, kind: output, shape index: {}]  }
   0x1   :  { %12 = vsyncpa [#allocation6], 0 }
   0x2   :  { %13 = vsyncpa [#allocation9], 0 }
   0x3   :  { %14 = vsyncpa [#allocation4], 0  ;;  %s1676_s21 = smov [#allocation5]   ;;  %s1536_s25 = scalar_lea.hbm %s1848_s1, 8192 }
   0x4   :  { %s30_s22 = sshll.u32 %s1676_s21, 4  ;;  %p1537_p0 = scmp.ne.s32.totalorder %s1848_s1, %s1536_s25  ;;  %s31_s22 = int_to_ptr.vmem [resolvable:$true] %s30_s22 }
   0x5   :  { %p1540_p1 = scmp.lt.u32.totalorder %s1536_s25, %s1848_s1 }
   0x7   :  { %p1542_p2 = pnand %p1540_p1, %p1537_p0 }
   0x9   :  { %1545 = shalt.err (!%p1542_p2)
}
   0xa   :  { %s1546_s30 = scalar_lea.vmem %s31_s22, 8192  ;;  %p1551_p4 = scmp.lt.s32.totalorder %s31_s22, %s31_s22 }
   0xb   :  { %p1547_p3 = scmp.ne.s32.totalorder %s31_s22, %s1546_s30  ;;  %p1552_p5 = scmp.lt.s32.totalorder %s1546_s30, %s1546_s30 }
   0xd   :  { %p1553_p6 = por %p1552_p5, %p1551_p4 }
   0xf   :  { %p1554_p7 = pnand %p1553_p6, %p1547_p3 }
  0x11   :  { %1557 = shalt.err (!%p1554_p7)
}
  0x12   :  { %s1677_s7 = smov 64   ;;  %s1678_s8 = smov 4  }
  0x13   :  { %36 = dma.hbm_to_vmem [thread:$0]  %s1848_s1, 8192, %s31_s22, [#allocation6], %s1677_s7, %s1677_s7, %s1678_s8  }
  0x14   :  { %s1679_s11 = smov [#allocation8]   ;;  %s1680_s13 = smov [#allocation2]  }
  0x15   :  { %s54_s12 = sshll.u32 %s1679_s11, 4  ;;  %s21_s14 = sshll.u32 %s1680_s13, 4  ;;  %s55_s12 = int_to_ptr.vmem [resolvable:$true] %s54_s12  ;;  %s22_s14 = int_to_ptr.vmem [resolvable:$true] %s21_s14 }
  0x16   :  { %s1558_s17 = scalar_lea.hbm %s1850_s3, 1024 }
  0x17   :  { %p1559_p8 = scmp.ne.s32.totalorder %s1850_s3, %s1558_s17  ;;  %p1562_p9 = scmp.lt.u32.totalorder %s1558_s17, %s1850_s3 }
  0x19   :  { %p1564_p10 = pnand %p1562_p9, %p1559_p8 }
  0x1b   :  { %1567 = shalt.err (!%p1564_p10)
}
  0x1c   :  { %s1568_s1 = scalar_lea.vmem %s55_s12, 1024  ;;  %p1573_p12 = scmp.lt.s32.totalorder %s55_s12, %s55_s12 }
  0x1d   :  { %p1569_p11 = scmp.ne.s32.totalorder %s55_s12, %s1568_s1  ;;  %p1574_p13 = scmp.lt.s32.totalorder %s1568_s1, %s1568_s1 }
  0x1f   :  { %p1575_p0 = por %p1574_p13, %p1573_p12 }
  0x21   :  { %p1576_p1 = pnand %p1575_p0, %p1569_p11 }
  0x23   :  { %1579 = shalt.err (!%p1576_p1)
}
  0x24   :  { %60 = dma.hbm_to_vmem [thread:$0]  %s1850_s3, 1024, %s55_s12, [#allocation9], %s1677_s7, %s1677_s7, %s1678_s8  }
  0x25   :  { %s1580_s26 = scalar_lea.hbm %s1847_s0, 1024 }
  0x26   :  { %p1581_p2 = scmp.ne.s32.totalorder %s1847_s0, %s1580_s26  ;;  %p1584_p3 = scmp.lt.u32.totalorder %s1580_s26, %s1847_s0 }
  0x28   :  { %p1586_p4 = pnand %p1584_p3, %p1581_p2 }
  0x2a   :  { %1589 = shalt.err (!%p1586_p4)
}
  0x2b   :  { %s1590_s9 = scalar_lea.vmem %s22_s14, 1024  ;;  %p1595_p6 = scmp.lt.s32.totalorder %s22_s14, %s22_s14 }
  0x2c   :  { %p1591_p5 = scmp.ne.s32.totalorder %s22_s14, %s1590_s9  ;;  %p1596_p7 = scmp.lt.s32.totalorder %s1590_s9, %s1590_s9 }
  0x2e   :  { %p1597_p8 = por %p1596_p7, %p1595_p6 }
  0x30   :  { %p1598_p9 = pnand %p1597_p8, %p1591_p5 }
  0x32   :  { %1601 = shalt.err (!%p1598_p9)
}
  0x33   :  { %24 = dma.hbm_to_vmem [thread:$0]  %s1847_s0, 1024, %s22_s14, [#allocation3]  }
  0x34   :  { %s1681_s11 = smov [#allocation7]   ;;  %s1682_s13 = smov [#allocation10]  }
  0x35   :  { %s42_s12 = sshll.u32 %s1681_s11, 4  ;;  %s66_s15 = sshll.u32 %s1682_s13, 4  ;;  %s43_s12 = int_to_ptr.vmem [resolvable:$true] %s42_s12  ;;  %s67_s15 = int_to_ptr.vmem [resolvable:$true] %s66_s15 }
  0x36   :  { %s1602_s18 = scalar_lea.hbm %s1849_s2, 1024 }
  0x37   :  { %p1603_p10 = scmp.ne.s32.totalorder %s1849_s2, %s1602_s18  ;;  %p1606_p11 = scmp.lt.u32.totalorder %s1602_s18, %s1849_s2 }
  0x39   :  { %p1608_p12 = pnand %p1606_p11, %p1603_p10 }
  0x3b   :  { %1611 = shalt.err (!%p1608_p12)
}
  0x3c   :  { %s1612_s0 = scalar_lea.vmem %s43_s12, 1024  ;;  %p1617_p0 = scmp.lt.s32.totalorder %s43_s12, %s43_s12 }
  0x3d   :  { %p1613_p13 = scmp.ne.s32.totalorder %s43_s12, %s1612_s0  ;;  %p1618_p1 = scmp.lt.s32.totalorder %s1612_s0, %s1612_s0 }
  0x3f   :  { %p1619_p2 = por %p1618_p1, %p1617_p0 }
  0x41   :  { %p1620_p3 = pnand %p1619_p2, %p1613_p13 }
  0x43   :  { %1623 = shalt.err (!%p1620_p3)
}
  0x44   :  { %48 = dma.hbm_to_vmem [thread:$0]  %s1849_s2, 1024, %s43_s12, [#allocation6], %s1677_s7, %s1677_s7, %s1678_s8  }
  0x45   :  { %s1624_s25 = scalar_lea.hbm %s1851_s4, 1024 }
  0x46   :  { %p1625_p4 = scmp.ne.s32.totalorder %s1851_s4, %s1624_s25  ;;  %p1628_p5 = scmp.lt.u32.totalorder %s1624_s25, %s1851_s4 }
  0x48   :  { %p1630_p6 = pnand %p1628_p5, %p1625_p4 }
  0x4a   :  { %1633 = shalt.err (!%p1630_p6)
}
  0x4b   :  { %s1634_s30 = scalar_lea.vmem %s67_s15, 1024  ;;  %p1639_p8 = scmp.lt.s32.totalorder %s67_s15, %s67_s15 }
  0x4c   :  { %p1635_p7 = scmp.ne.s32.totalorder %s67_s15, %s1634_s30  ;;  %p1640_p9 = scmp.lt.s32.totalorder %s1634_s30, %s1634_s30 }
  0x4e   :  { %p1641_p10 = por %p1640_p9, %p1639_p8 }
  0x50   :  { %p1642_p11 = pnand %p1641_p10, %p1635_p7 }
  0x52   :  { %1645 = shalt.err (!%p1642_p11)
}
  0x53   :  { %72 = dma.hbm_to_vmem [thread:$0]  %s1851_s4, 1024, %s67_s15, [#allocation9], %s1677_s7, %s1677_s7, %s1678_s8  }
  0x54   :  { %1668 = dma.done.wait [#allocation3], 1024  }
  0x55   :  { %1669 = vsyncadd [#allocation3], 4294966272 }
  0x56   :  { %1670 = dma.done.wait [#allocation6], 9216  }
  0x57   :  { %1671 = vsyncadd [#allocation6], 4294958080 }
  0x58   :  { %1672 = dma.done.wait [#allocation9], 2048  }
  0x59   :  { %1673 = vsyncadd [#allocation9], 4294965248  ;;  %v1448_v0 = vld [vmem:[#allocation5 + $0x40] sm:$0xff]   ;;  %v1452_v4 = vld [vmem:[#allocation5 + $0x48] sm:$0xff]   ;;  %vm1684_vm0 = vmmov 0   ;;  %s1685_s15 = smov [#allocation11]  }
  0x5a   :  { %v1449_v1 = vld [vmem:[#allocation5 + $0xc0] sm:$0xff]   ;;  %1263 = vmatprep.subr.bf16.mxu0 %v1448_v0  ;;  %v1453_v5 = vld [vmem:[#allocation5 + $0xc8] sm:$0xff]   ;;  %v1456_v8 = vld [vmem:[#allocation5 + $0x50] sm:$0xff]   ;;  %s1160_s16 = sshll.u32 %s1685_s15, 4  ;;  %vm1152_vm1 = vcmask 57344   ;;  %s1161_s16 = int_to_ptr.vmem [resolvable:$true] %s1160_s16 }
  0x5b   :  { %v1450_v2 = vld [vmem:[#allocation5] sm:$0xff]   ;;  %1285 = vmatprep.subr.bf16.mxu1 %v1449_v1  ;;  %v1454_v6 = vld [vmem:[#allocation5 + $0x8] sm:$0xff]   ;;  %v1457_v9 = vld [vmem:[#allocation5 + $0xd0] sm:$0xff]   ;;  %s1646_s17 = scalar_lea.vmem %s1161_s16, 16  ;;  %s1650_s18 = scalar_lea.vmem %s1161_s16, 32 }
  0x5c   :  { %v1451_v3 = vld [vmem:[#allocation5 + $0x80] sm:$0xff]   ;;  %1264 = vmatpush3.bf16.msra.mxu0 %v1450_v2  ;;  %v1455_v7 = vld [vmem:[#allocation5 + $0x88] sm:$0xff]   ;;  %v1458_v10 = vld [vmem:[#allocation5 + $0x10] sm:$0xff]   ;;  %p1647_p12 = scmp.ne.s32.totalorder %s1161_s16, %s1646_s17  ;;  %p1651_p13 = scmp.lt.s32.totalorder %s1161_s16, %s1161_s16 }
  0x5d   :  { %1286 = vmatpush3.bf16.msra.mxu1 %v1451_v3  ;;  %1265 = vmatprep.subr.bf16.mxu0 %v1452_v4  ;;  %v1459_v11 = vld [vmem:[#allocation5 + $0x90] sm:$0xff]   ;;  %v1460_v12 = vld [vmem:[#allocation5 + $0x58] sm:$0xff]   ;;  %v1464_v16 = vld [vmem:[#allocation5 + $0x60] sm:$0xff]   ;;  %p1652_p0 = scmp.lt.s32.totalorder %s1650_s18, %s1646_s17 }
  0x5e   :  { %1287 = vmatprep.subr.bf16.mxu1 %v1453_v5  ;;  %v1461_v13 = vld [vmem:[#allocation5 + $0xd8] sm:$0xff]   ;;  %v1465_v17 = vld [vmem:[#allocation5 + $0xe0] sm:$0xff]   ;;  %v1468_v20 = vld [vmem:[#allocation5 + $0x68] sm:$0xff]  }
  0x5f   :  { %v1462_v14 = vld [vmem:[#allocation5 + $0x18] sm:$0xff]   ;;  %v1466_v18 = vld [vmem:[#allocation5 + $0x20] sm:$0xff]   ;;  %v1469_v21 = vld [vmem:[#allocation5 + $0xe8] sm:$0xff]   ;;  %p1653_p1 = por %p1652_p0, %p1651_p13 }
  0x60   :  { %1266 = vmatpush3.bf16.msra.mxu0 %v1454_v6  ;;  %v1463_v15 = vld [vmem:[#allocation5 + $0x98] sm:$0xff]   ;;  %v1467_v19 = vld [vmem:[#allocation5 + $0xa0] sm:$0xff]   ;;  %v1470_v22 = vld [vmem:[#allocation5 + $0x28] sm:$0xff]  }
  0x61   :  { %1288 = vmatpush3.bf16.msra.mxu1 %v1455_v7  ;;  %1267 = vmatprep.subr.bf16.mxu0 %v1456_v8  ;;  %v1471_v23 = vld [vmem:[#allocation5 + $0xa8] sm:$0xff]   ;;  %v1472_v24 = vld [vmem:[#allocation5 + $0x70] sm:$0xff]   ;;  %v1476_v28 = vld [vmem:[#allocation5 + $0x78] sm:$0xff]   ;;  %p1654_p2 = pnand %p1653_p1, %p1647_p12 }
  0x62   :  { %1289 = vmatprep.subr.bf16.mxu1 %v1457_v9  ;;  %v1473_v25 = vld [vmem:[#allocation5 + $0xf0] sm:$0xff]   ;;  %v1477_v29 = vld [vmem:[#allocation5 + $0xf8] sm:$0xff]   ;;  %v92_v32 = vld [vmem:[#allocation2 + $0x8] sm:$0xff] }
  0x63   :  { %v1474_v26 = vld [vmem:[#allocation5 + $0x30] sm:$0xff]   ;;  %v1478_v30 = vld [vmem:[#allocation5 + $0x38] sm:$0xff]   ;;  %v91_v34 = vld [vmem:[#allocation2] sm:$0xff]  ;;  %v100_v35 = vpack.c.bf16 %v92_v32, %v92_v32 }
  0x64   :  { %1268 = vmatpush3.bf16.msra.mxu0 %v1458_v10  ;;  %v1475_v27 = vld [vmem:[#allocation5 + $0xb0] sm:$0xff]   ;;  %v1479_v31 = vld [vmem:[#allocation5 + $0xb8] sm:$0xff]   ;;  %v99_v37 = vpack.c.bf16 %v91_v34, %v91_v34  ;;  %v1480_v40 = vld [vmem:[#allocation5 + $0x140] sm:$0xff]  }
  0x65   :  { %1290 = vmatpush3.bf16.msra.mxu1 %v1459_v11  ;;  %1269 = vmatprep.subr.bf16.mxu0 %v1460_v12  ;;  %v94_v33 = vld [vmem:[#allocation2 + $0x18] sm:$0xff]  ;;  %v93_v38 = vld [vmem:[#allocation2 + $0x10] sm:$0xff]  ;;  %v1481_v41 = vld [vmem:[#allocation5 + $0x1c0] sm:$0xff]  }
  0x66   :  { %1291 = vmatprep.subr.bf16.mxu1 %v1461_v13  ;;  %v102_v36 = vpack.c.bf16 %v94_v33, %v94_v33  ;;  %v101_v39 = vpack.c.bf16 %v93_v38, %v93_v38  ;;  %656 = vmatprep.mubr.bf16.mxu0 %v100_v35  ;;  %v1482_v42 = vld [vmem:[#allocation5 + $0x100] sm:$0xff]   ;;  %v1484_v44 = vld [vmem:[#allocation5 + $0x148] sm:$0xff]   ;;  %v1488_v48 = vld [vmem:[#allocation5 + $0x150] sm:$0xff]  }
  0x67   :  { %v1483_v43 = vld [vmem:[#allocation5 + $0x180] sm:$0xff]   ;;  %v1485_v45 = vld [vmem:[#allocation5 + $0x1c8] sm:$0xff]   ;;  %v1489_v49 = vld [vmem:[#allocation5 + $0x1d0] sm:$0xff]  }
  0x68   :  { %1270 = vmatpush3.bf16.msra.mxu0 %v1462_v14  ;;  %696 = vmatprep.mubr.bf16.mxu1 %v102_v36  ;;  %v1486_v46 = vld [vmem:[#allocation5 + $0x108] sm:$0xff]   ;;  %v1490_v50 = vld [vmem:[#allocation5 + $0x110] sm:$0xff]   ;;  %v1492_v52 = vld [vmem:[#allocation5 + $0x158] sm:$0xff]  }
  0x69   :  { %1292 = vmatpush3.bf16.msra.mxu1 %v1463_v15  ;;  %1271 = vmatprep.subr.bf16.mxu0 %v1464_v16  ;;  %v1487_v47 = vld [vmem:[#allocation5 + $0x188] sm:$0xff]   ;;  %v1491_v51 = vld [vmem:[#allocation5 + $0x190] sm:$0xff]   ;;  %v1493_v53 = vld [vmem:[#allocation5 + $0x1d8] sm:$0xff]  }
  0x6a   :  { %1293 = vmatprep.subr.bf16.mxu1 %v1465_v17  ;;  %v1494_v54 = vld [vmem:[#allocation5 + $0x118] sm:$0xff]   ;;  %v1496_v56 = vld [vmem:[#allocation5 + $0x160] sm:$0xff]   ;;  %v1500_v60 = vld [vmem:[#allocation5 + $0x168] sm:$0xff]   ;;  %v1683_v17 = vmov 0.0  }
  0x6b   :  { %v1495_v55 = vld [vmem:[#allocation5 + $0x198] sm:$0xff]   ;;  %v1497_v57 = vld [vmem:[#allocation5 + $0x1e0] sm:$0xff]   ;;  %v1501_v61 = vld [vmem:[#allocation5 + $0x1e8] sm:$0xff]  }
  0x6c   :  { %1272 = vmatpush3.bf16.msra.mxu0 %v1466_v18  ;;  %v1498_v58 = vld [vmem:[#allocation5 + $0x120] sm:$0xff]   ;;  %v1502_v62 = vld [vmem:[#allocation5 + $0x128] sm:$0xff]   ;;  %v1504_v0 = vld [vmem:[#allocation5 + $0x170] sm:$0xff]  }
  0x6d   :  { %1294 = vmatpush3.bf16.msra.mxu1 %v1467_v19  ;;  %1273 = vmatprep.subr.bf16.mxu0 %v1468_v20  ;;  %v1499_v59 = vld [vmem:[#allocation5 + $0x1a0] sm:$0xff]   ;;  %v1503_v63 = vld [vmem:[#allocation5 + $0x1a8] sm:$0xff]   ;;  %v1505_v1 = vld [vmem:[#allocation5 + $0x1f0] sm:$0xff]  }
  0x6e   :  { %1295 = vmatprep.subr.bf16.mxu1 %v1469_v21  ;;  %v1506_v2 = vld [vmem:[#allocation5 + $0x130] sm:$0xff]   ;;  %v1508_v4 = vld [vmem:[#allocation5 + $0x178] sm:$0xff]   ;;  %v96_v8 = vld [vmem:[#allocation2 + $0x28] sm:$0xff] }
  0x6f   :  { %v1507_v3 = vld [vmem:[#allocation5 + $0x1b0] sm:$0xff]   ;;  %v1509_v5 = vld [vmem:[#allocation5 + $0x1f8] sm:$0xff]   ;;  %v104_v10 = vpack.c.bf16 %v96_v8, %v96_v8  ;;  %v95_v12 = vld [vmem:[#allocation2 + $0x20] sm:$0xff] }
  0x70   :  { %1274 = vmatpush3.bf16.msra.mxu0 %v1470_v22  ;;  %v1510_v6 = vld [vmem:[#allocation5 + $0x138] sm:$0xff]   ;;  %v97_v13 = vld [vmem:[#allocation2 + $0x30] sm:$0xff]  ;;  %v103_v14 = vpack.c.bf16 %v95_v12, %v95_v12  ;;  %v1512_v16 = vld [vmem:[#allocation7] sm:$0xff]  }
  0x71   :  { %1296 = vmatpush3.bf16.msra.mxu1 %v1471_v23  ;;  %1275 = vmatprep.subr.bf16.mxu0 %v1472_v24  ;;  %v1511_v7 = vld [vmem:[#allocation5 + $0x1b8] sm:$0xff]   ;;  %v105_v15 = vpack.c.bf16 %v97_v13, %v97_v13  ;;  %v1513_v18 = vld [vmem:[#allocation7 + $0x8] sm:$0xff]   ;;  %v1514_v19 = vld [vmem:[#allocation7 + $0x10] sm:$0xff]  }
  0x72   :  { %1297 = vmatprep.subr.bf16.mxu1 %v1473_v25  ;;  %v98_v9 = vld [vmem:[#allocation2 + $0x38] sm:$0xff]  ;;  %v1516_v21 = vld [vmem:[#allocation7 + $0x20] sm:$0xff]   ;;  %v1517_v22 = vld [vmem:[#allocation7 + $0x28] sm:$0xff]  }
  0x73   :  { %v106_v11 = vpack.c.bf16 %v98_v9, %v98_v9  ;;  %v1515_v20 = vld [vmem:[#allocation7 + $0x18] sm:$0xff]   ;;  %v1518_v23 = vld [vmem:[#allocation7 + $0x30] sm:$0xff]   ;;  %v1520_v25 = vld [vmem:[#allocation8] sm:$0xff]  }
  0x74   :  { %1276 = vmatpush3.bf16.msra.mxu0 %v1474_v26  ;;  %v1519_v24 = vld [vmem:[#allocation7 + $0x38] sm:$0xff]   ;;  %v1521_v26 = vld [vmem:[#allocation8 + $0x8] sm:$0xff]   ;;  %v1171_v33 = vld [vmem:[%s1852_s5] ss:$0 sm:$0xff] }
  0x75   :  { %1298 = vmatpush3.bf16.msra.mxu1 %v1475_v27  ;;  %1277 = vmatprep.subr.bf16.mxu0 %v1476_v28  ;;  %v1522_v27 = vld [vmem:[#allocation8 + $0x10] sm:$0xff]   ;;  %v1523_v28 = vld [vmem:[#allocation8 + $0x18] sm:$0xff]  }
  0x76   :  { %1299 = vmatprep.subr.bf16.mxu1 %v1477_v29  ;;  %v1524_v29 = vld [vmem:[#allocation8 + $0x20] sm:$0xff]   ;;  %v1534_v12 = vld [vmem:[#allocation10 + $0x30] sm:$0xff]   ;;  %v1535_v13 = vld [vmem:[#allocation10 + $0x38] sm:$0xff]  }
  0x78   :  { %1278 = vmatpush3.bf16.msra.mxu0 %v1478_v30  ;;  %v1525_v30 = vld [vmem:[#allocation8 + $0x28] sm:$0xff]  }
  0x79   :  { %1300 = vmatpush3.bf16.msra.mxu1 %v1479_v31  ;;  %1307 = vmatprep.subr.bf16.mxu0 %v1480_v40 }
  0x7a   :  { %1329 = vmatprep.subr.bf16.mxu1 %v1481_v41 }
  0x7b   :  { %657 = vmatmul.mubr.bf16.vlgmr.msra.gmra.mrb[0].mxu0 %v99_v37 }
  0x7c   :  { %697 = vmatmul.mubr.bf16.vlgmr.msra.gmra.mrb[0].mxu1 %v101_v39  ;;  %1308 = vmatpush3.bf16.msra.mxu0 %v1482_v42 }
  0x7d   :  { %1330 = vmatpush3.bf16.msra.mxu1 %v1483_v43  ;;  %1309 = vmatprep.subr.bf16.mxu0 %v1484_v44 }
  0x7e   :  { %1331 = vmatprep.subr.bf16.mxu1 %v1485_v45  ;;  %736 = vmatprep.mubr.bf16.mxu0 %v104_v10 }
  0x7f   :  { %776 = vmatprep.mubr.bf16.mxu1 %v106_v11 }
  0x80   :  { %1310 = vmatpush3.bf16.msra.mxu0 %v1486_v46 }
  0x81   :  { %1332 = vmatpush3.bf16.msra.mxu1 %v1487_v47  ;;  %1311 = vmatprep.subr.bf16.mxu0 %v1488_v48 }
  0x82   :  { %1333 = vmatprep.subr.bf16.mxu1 %v1489_v49 }
  0x84   :  { %1312 = vmatpush3.bf16.msra.mxu0 %v1490_v50 }
  0x85   :  { %1334 = vmatpush3.bf16.msra.mxu1 %v1491_v51  ;;  %1313 = vmatprep.subr.bf16.mxu0 %v1492_v52 }
  0x86   :  { %1335 = vmatprep.subr.bf16.mxu1 %v1493_v53 }
  0x88   :  { %1314 = vmatpush3.bf16.msra.mxu0 %v1494_v54 }
  0x89   :  { %1336 = vmatpush3.bf16.msra.mxu1 %v1495_v55  ;;  %1315 = vmatprep.subr.bf16.mxu0 %v1496_v56 }
  0x8a   :  { %1337 = vmatprep.subr.bf16.mxu1 %v1497_v57 }
  0x8c   :  { %1316 = vmatpush3.bf16.msra.mxu0 %v1498_v58 }
  0x8d   :  { %1338 = vmatpush3.bf16.msra.mxu1 %v1499_v59  ;;  %1317 = vmatprep.subr.bf16.mxu0 %v1500_v60  ;;  %v1526_v59 = vld [vmem:[#allocation8 + $0x30] sm:$0xff]   ;;  %v1527_v60 = vld [vmem:[#allocation8 + $0x38] sm:$0xff]  }
  0x8e   :  { %1339 = vmatprep.subr.bf16.mxu1 %v1501_v61  ;;  %v1528_v61 = vld [vmem:[#allocation10] sm:$0xff]  }
  0x90   :  { %1318 = vmatpush3.bf16.msra.mxu0 %v1502_v62  ;;  %v1529_v62 = vld [vmem:[#allocation10 + $0x8] sm:$0xff]  }
  0x91   :  { %1340 = vmatpush3.bf16.msra.mxu1 %v1503_v63  ;;  %1319 = vmatprep.subr.bf16.mxu0 %v1504_v0  ;;  %v1530_v63 = vld [vmem:[#allocation10 + $0x10] sm:$0xff]   ;;  %v1531_v0 = vld [vmem:[#allocation10 + $0x18] sm:$0xff]  }
  0x92   :  { %1341 = vmatprep.subr.bf16.mxu1 %v1505_v1  ;;  %v1532_v1 = vld [vmem:[#allocation10 + $0x20] sm:$0xff]  }
  0x94   :  { %1320 = vmatpush3.bf16.msra.mxu0 %v1506_v2  ;;  %v1533_v2 = vld [vmem:[#allocation10 + $0x28] sm:$0xff]  }
  0x95   :  { %1342 = vmatpush3.bf16.msra.mxu1 %v1507_v3  ;;  %1321 = vmatprep.subr.bf16.mxu0 %v1508_v4  ;;  %v1236_v3 = vld [vmem:[%s1852_s5 + $0x1] ss:$0 sm:$0xff] }
  0x96   :  { %1343 = vmatprep.subr.bf16.mxu1 %v1509_v5 }
  0x98   :  { %1322 = vmatpush3.bf16.msra.mxu0 %v1510_v6 }
  0x99   :  { %1344 = vmatpush3.bf16.msra.mxu1 %v1511_v7  ;;  %1378 = vmatprep.subr.bf16.mxu0 %v1683_v17 }
  0x9a   :  { %1398 = vmatprep.subr.bf16.mxu1 %v1683_v17 }
  0x9b   :  { %737 = vmatmul.mubr.bf16.vlgmr.msra.gmra.mrb[4].mxu0 %v103_v14  ;;  %v1245_v14 = vld [vmem:[%s1852_s5 + $0x2] ss:$0 sm:$0xff] }
  0x9c   :  { %777 = vmatmul.mubr.bf16.vlgmr.msra.gmra.mrb[4].mxu1 %v105_v15  ;;  %1379 = vmatpush3.bf16.msra.mxu0 %v1512_v16 }
  0x9d   :  { %1380 = vmatprep.subr.bf16.mxu0 %v1683_v17  ;;  %1394 = vmatprep.mubr.msk.bf16.mxu0 %vm1684_vm0, %v1683_v17 }
  0x9e   :  { %1414 = vmatprep.mubr.msk.bf16.mxu1 %vm1684_vm0, %v1683_v17  ;;  %1399 = vmatpush3.bf16.msra.mxu1 %v1520_v25 }
  0x9f   :  { %1400 = vmatprep.subr.bf16.mxu1 %v1683_v17 }
  0xa0   :  { %1381 = vmatpush3.bf16.msra.mxu0 %v1513_v18 }
  0xa1   :  { %1382 = vmatprep.subr.bf16.mxu0 %v1683_v17 }
  0xa2   :  { %1401 = vmatpush3.bf16.msra.mxu1 %v1521_v26 }
  0xa3   :  { %1402 = vmatprep.subr.bf16.mxu1 %v1683_v17 }
  0xa4   :  { %1383 = vmatpush3.bf16.msra.mxu0 %v1514_v19 }
  0xa5   :  { %1384 = vmatprep.subr.bf16.mxu0 %v1683_v17 }
  0xa6   :  { %1403 = vmatpush3.bf16.msra.mxu1 %v1522_v27 }
  0xa7   :  { %1404 = vmatprep.subr.bf16.mxu1 %v1683_v17 }
  0xa8   :  { %1385 = vmatpush3.bf16.msra.mxu0 %v1515_v20 }
  0xa9   :  { %1386 = vmatprep.subr.bf16.mxu0 %v1683_v17 }
  0xaa   :  { %1405 = vmatpush3.bf16.msra.mxu1 %v1523_v28 }
  0xab   :  { %1406 = vmatprep.subr.bf16.mxu1 %v1683_v17 }
  0xac   :  { %1387 = vmatpush3.bf16.msra.mxu0 %v1516_v21 }
  0xad   :  { %1388 = vmatprep.subr.bf16.mxu0 %v1683_v17 }
  0xae   :  { %1407 = vmatpush3.bf16.msra.mxu1 %v1524_v29 }
  0xaf   :  { %1408 = vmatprep.subr.bf16.mxu1 %v1683_v17 }
  0xb0   :  { %1389 = vmatpush3.bf16.msra.mxu0 %v1517_v22 }
  0xb1   :  { %1390 = vmatprep.subr.bf16.mxu0 %v1683_v17 }
  0xb2   :  { %1409 = vmatpush3.bf16.msra.mxu1 %v1525_v30 }
  0xb3   :  { %1410 = vmatprep.subr.bf16.mxu1 %v1683_v17 }
  0xb4   :  { %1391 = vmatpush3.bf16.msra.mxu0 %v1518_v23 }
  0xb5   :  { %1392 = vmatprep.subr.bf16.mxu0 %v1683_v17 }
  0xb6   :  { %1411 = vmatpush3.bf16.msra.mxu1 %v1526_v59 }
  0xb7   :  { %1412 = vmatprep.subr.bf16.mxu1 %v1683_v17 }
  0xb8   :  { %1393 = vmatpush3.bf16.msra.mxu0 %v1519_v24  ;;  %v1254_v24 = vld [vmem:[%s1852_s5 + $0x3] ss:$0 sm:$0xff] }
  0xb9   :  { %1418 = vmatprep.subr.bf16.mxu0 %v1683_v17 }
  0xba   :  { %1413 = vmatpush3.bf16.msra.mxu1 %v1527_v60 }
 0x14e   :  { %v1279_v31 = vpop.f32.mrb[0].mxu0 }
 0x14f   :  { %v1301_v32 = vpop.f32.mrb[0].mxu1  ;;  %v1280_v34 = vpop.f32.mrb[1].mxu0 }
 0x150   :  { %v1302_v35 = vpop.f32.mrb[1].mxu1  ;;  %v1281_v36 = vadd.f32 %v1280_v34, %v1279_v31  ;;  %v1282_v38 = vpop.f32.mrb[2].mxu0 }
 0x151   :  { %v1303_v37 = vadd.f32 %v1302_v35, %v1301_v32  ;;  %v1304_v39 = vpop.f32.mrb[2].mxu1  ;;  %v1283_v40 = vpop.f32.mrb[3].mxu0 }
 0x152   :  { %v1305_v41 = vpop.f32.mrb[3].mxu1  ;;  %v659_v42 = vadd.f32 %v1281_v36, %v1171_v33 }
 0x154   :  { %v699_v43 = vadd.f32 %v1303_v37, %v659_v42 }
 0x16e   :  { %v1323_v44 = vpop.f32.mrb[4].mxu0 }
 0x16f   :  { %v1345_v45 = vpop.f32.mrb[4].mxu1  ;;  %v1324_v46 = vpop.f32.mrb[5].mxu0 }
 0x170   :  { %v1325_v47 = vadd.f32 %v1324_v46, %v1323_v44  ;;  %v1346_v48 = vpop.f32.mrb[5].mxu1  ;;  %v1326_v49 = vpop.f32.mrb[6].mxu0 }
 0x171   :  { %v1347_v50 = vadd.f32 %v1346_v48, %v1345_v45  ;;  %v1348_v51 = vpop.f32.mrb[6].mxu1  ;;  %v1327_v52 = vpop.f32.mrb[7].mxu0 }
 0x172   :  { %v739_v53 = vadd.f32 %v1325_v47, %v699_v43  ;;  %v1349_v54 = vpop.f32.mrb[7].mxu1 }
 0x174   :  { %v779_v55 = vadd.f32 %v1347_v50, %v739_v53 }
 0x176   :  { %v784_v56 = vmul.f32 0.01, %v779_v55 }
 0x178   :  { %v785_v57 = vmax.f32 %v779_v55, %v784_v56 }
 0x17a   :  { %v786_v58 = vpack.c.bf16 %v785_v57, %v785_v57 }
 0x17c   :  { %1395 = vmatmul.mubr.bf16.vlgmr.msra.gmra.mrb[8].mxu0 %v786_v58 }
 0x17d   :  { %1434 = vmatprep.mubr.msk.bf16.mxu0 %vm1684_vm0, %v1683_v17  ;;  %1419 = vmatpush3.bf16.msra.mxu0 %v1528_v61 }
 0x17e   :  { %1420 = vmatprep.subr.bf16.mxu0 %v1683_v17 }
 0x181   :  { %1421 = vmatpush3.bf16.msra.mxu0 %v1529_v62 }
 0x182   :  { %1422 = vmatprep.subr.bf16.mxu0 %v1683_v17 }
 0x185   :  { %1423 = vmatpush3.bf16.msra.mxu0 %v1530_v63 }
 0x186   :  { %1424 = vmatprep.subr.bf16.mxu0 %v1683_v17 }
 0x189   :  { %1425 = vmatpush3.bf16.msra.mxu0 %v1531_v0 }
 0x18a   :  { %1426 = vmatprep.subr.bf16.mxu0 %v1683_v17 }
 0x18d   :  { %1427 = vmatpush3.bf16.msra.mxu0 %v1532_v1 }
 0x18e   :  { %1428 = vmatprep.subr.bf16.mxu0 %v1683_v17 }
 0x191   :  { %1429 = vmatpush3.bf16.msra.mxu0 %v1533_v2 }
 0x192   :  { %1430 = vmatprep.subr.bf16.mxu0 %v1683_v17 }
 0x195   :  { %1431 = vmatpush3.bf16.msra.mxu0 %v1534_v12 }
 0x196   :  { %1432 = vmatprep.subr.bf16.mxu0 %v1683_v17 }
 0x199   :  { %1433 = vmatpush3.bf16.msra.mxu0 %v1535_v13 }
 0x24f   :  { %v890_v4 = vpop.f32.mrb[8].mxu0 }
 0x250   :  { %v891_v5 = vadd.f32 %v1236_v3, %v890_v4  ;;  %v1396_v6 = vpop.f32.mrb[9].mxu0 }
 0x251   :  { %v893_v7 = vpop.f32.mrb[10].mxu0 }
 0x252   :  { %v896_v8 = vmul.f32 0.01, %v891_v5  ;;  %v1397_v9 = vpop.f32.mrb[11].mxu0 }
 0x254   :  { %v897_v10 = vmax.f32 %v891_v5, %v896_v8 }
 0x256   :  { %v898_v11 = vpack.c.bf16 %v897_v10, %v897_v10 }
 0x258   :  { %1415 = vmatmul.mubr.bf16.vlgmr.msra.gmra.mrb[8].mxu1 %v898_v11 }
 0x32b   :  { %v1002_v15 = vpop.f32.mrb[8].mxu1 }
 0x32c   :  { %v1003_v16 = vadd.f32 %v1245_v14, %v1002_v15  ;;  %v1416_v18 = vpop.f32.mrb[9].mxu1 }
 0x32d   :  { %v1005_v19 = vpop.f32.mrb[10].mxu1 }
 0x32e   :  { %v1008_v20 = vmul.f32 0.01, %v1003_v16  ;;  %v1417_v21 = vpop.f32.mrb[11].mxu1 }
 0x330   :  { %v1009_v22 = vmax.f32 %v1003_v16, %v1008_v20 }
 0x332   :  { %v1010_v23 = vpack.c.bf16 %v1009_v22, %v1009_v22 }
 0x334   :  { %1435 = vmatmul.mubr.bf16.vlgmr.msra.gmra.mrb[12].mxu0 %v1010_v23 }
 0x407   :  { %v1114_v17 = vpop.f32.mrb[12].mxu0 }
 0x408   :  { %v1436_v25 = vpop.f32.mrb[13].mxu0  ;;  %v1115_v26 = vadd.f32 %v1254_v24, %v1114_v17 }
 0x409   :  { %v1117_v27 = vpop.f32.mrb[14].mxu0 }
 0x40a   :  { %1120 = vxpose.xlu0.b32.start.end [1/1] (short) (narrow) %v1115_v26, 8  ;;  %v1437_v28 = vpop.f32.mrb[15].mxu0 }
 0x48a   :  { %v1136_v29 = vpop.trf.xlu0 }
 0x48b   :  { %1153 = vst.msk [vmem:[#allocation11] sm:$0x1] %vm1152_vm1, %v1136_v29 }
 0x48c   :  { %1657 = shalt.err (!%p1654_p2)
}
 0x48d   :  { %s1658_s20 = scalar_lea.hbm %s1853_s6, 16 }
 0x48e   :  { %p1659_p3 = scmp.ne.s32.totalorder %s1853_s6, %s1658_s20  ;;  %p1662_p4 = scmp.lt.u32.totalorder %s1658_s20, %s1853_s6 }
 0x490   :  { %p1664_p5 = pnand %p1662_p4, %p1659_p3 }
 0x492   :  { %1667 = shalt.err (!%p1664_p5)
}
 0x493   :  { %1163 = dma.vmem_to_hbm [thread:$0]  %s1161_s16, 16, %s1853_s6, [#allocation4]  }
 0x494   :  { %1674 = dma.done.wait [#allocation4], 16  }
 0x495   :  { %1675 = vsyncadd [#allocation4], 4294967280 }
 0x496   :  { %1167 = vsyncpa [#allocation3], 1 }
 0x497   :  { %1168 = vsyncpa [#allocation6], 1 }
 0x498   :  { %1169 = vsyncpa [#allocation9], 1 }
 0x499   :  { %1170 = vsyncpa [#allocation4], 1 }

</bundles_post_ra>
